<compile_context>
chip_gen: v7x
topology: tpu7x:2x2x1
jax: 0.10.0
libtpu: 0.0.40
codegen_flags: <defaults>
</compile_context>

<pallas_src>
import functools

import jax
import jax.numpy as jnp
import numpy as np
from jax.experimental import pallas as pl
from jax.experimental.pallas import tpu as pltpu


_LANE = 128  # output-chunk width processed per inner step (lane-dense stores)


def _round_up(x, m):
    return (x + m - 1) // m * m


def _vmem_limit_bytes():
    """Generation-aware scoped-VMEM budget (v5e/v6e: 128 MiB physical, v7x: 64 MiB)."""
    try:
        cap = int(pltpu.get_tpu_info().vmem_capacity_bytes)
    except Exception:
        cap = 64 * 1024 * 1024
    return max(32 * 1024 * 1024, cap // 2)


def _pick_batch_tile(n, c_in, c_out):
    """Largest batch tile with M = bt*C_out <= 128 (single v5e MXU pass), 8-aligned packed
    sublanes, and >= 4 grid steps when possible (>= 2 pipelined steps per v7x TensorCore)."""
    def ok(bt):
        return (bt * c_out <= 128) and (bt * c_in % 8 == 0 or bt == n)

    divs = [d for d in range(1, n + 1) if n % d == 0 and ok(d)]
    if not divs:
        return n
    for min_steps in (4, 2, 1):
        cands = [d for d in divs if n // d >= min_steps]
        if cands:
            return max(cands)
    return max(divs)


def decoder_tcn_kernel(x_ref, w_ref, b_ref, u_ref, o_ref, *, batch_tile, c_out, kernel_size):
    """One grid step processes `batch_tile` batch elements, chunked over 128 output columns.

    x_ref: (batch_tile*C_in, L_in_pad)            zero-padded input, rows packed (b, c)
    w_ref: (K, batch_tile*C_out, batch_tile*C_in) block-diagonal per-tap conv weights
    b_ref: (batch_tile*C_out, 1)                  bias replicated per packed row
    u_ref: (64 + K//2, 128 + K - 1)               0/1 nearest-x2 upsample operator (chunk-invariant)
    o_ref: (batch_tile, C_out, L_out_pad)         output, NCL layout, lane-padded to 128
    """
    K = kernel_size
    l_out_pad = o_ref.shape[2]
    n_chunks = l_out_pad // _LANE
    n_in = _LANE // 2 + K // 2

    # Static chunk loop over 128-wide output slabs (static slice offsets -> best codegen;
    # each iteration ends with a store, so unrolling does not inflate live ranges).
    for c in range(n_chunks):
        c0 = c * _LANE
        i0 = c * (_LANE // 2)

        # Nearest-x2 upsample of the needed input window via one tiny resident 0/1 operator:
        #   xu[:, m] = x[:, i0 + m // 2] == upsample(x)[:, c0 + m]
        xs = x_ref[:, i0:i0 + n_in]                                       # (B*C_in, n_in)
        xu = jnp.dot(xs, u_ref[...], preferred_element_type=jnp.float32)  # (B*C_in, 128+K-1)

        # Conv1d (valid) on the upsampled signal: K batch-packed block-diagonal matmuls,
        # accumulated (no concatenate).  M = B*C_out, contraction = B*C_in, N = 128 lanes.
        acc = jnp.dot(w_ref[0], xu[:, 0:_LANE], preferred_element_type=jnp.float32)
        for k in range(1, K):
            acc = acc + jnp.dot(w_ref[k], xu[:, k:k + _LANE],
                                preferred_element_type=jnp.float32)
        acc = acc + b_ref[...]                     # single broadcast bias add per chunk

        # Dropout2d(0.3): identity in eval mode.

        y = jnp.maximum(acc, 0.0)                  # (B*C_out, 128)

        # Norm_Relu(dim=1): per-position max over the C_out channels of the SAME batch
        # element.  Rows are packed (b, o), so this is a segmented reduce over 8-sublane
        # aligned groups: tile-aligned static slices, tiny VPU/XLU work, exact divide.
        for b in range(batch_tile):
            yb = y[b * c_out:(b + 1) * c_out, :]                           # (C_out, 128)
            mx = jnp.max(yb, axis=0, keepdims=True)
            o_ref[b, :, c0:c0 + _LANE] = (yb / (mx + 1e-5)).astype(o_ref.dtype)


def decoder_tcn_forward(x, weight, bias, *, batch_tile=None):
    """x: (N, C_in, L) (PyTorch NCL); weight: (C_out, C_in, K); bias: (C_out,). Returns f32."""
    N, C_in, L = x.shape
    C_out, C_in2, K = weight.shape
    assert C_in2 == C_in
    L_out = 2 * L - K + 1
    assert L_out >= 1

    if batch_tile is None:
        batch_tile = _pick_batch_tile(N, C_in, C_out)
    assert N % batch_tile == 0, (N, batch_tile)
    assert batch_tile * C_in % 8 == 0 or batch_tile == N, "packed sublanes must be 8-aligned"

    L_out_pad = _round_up(L_out, _LANE)          # lane-dense output blocks
    n_in = _LANE // 2 + K // 2                   # input columns needed per 128-col chunk
    L_in_pad = L_out_pad // 2 + K // 2           # so every chunk window is in bounds

    rows_in = batch_tile * C_in
    rows_out = batch_tile * C_out

    # Collapse (N, C_in) onto the sublane axis (free, row-major) and zero-pad L.  The pad
    # columns only ever feed output columns >= L_out, which are sliced off below.
    x2d = jnp.pad(x.astype(jnp.float32).reshape(N * C_in, L), ((0, 0), (0, L_in_pad - L)))

    # Tiny host-side parameter packing (all grid-invariant -> resident in VMEM):
    #   * per-tap block-diagonal weights kron(I_Btile, W[:, :, k])
    #   * bias replicated per packed (b, o) row
    #   * the 0/1 nearest-x2 upsample operator for one 128-wide output chunk
    w32 = weight.astype(jnp.float32)
    eye = jnp.eye(batch_tile, dtype=jnp.float32)
    w_bd = jnp.stack([jnp.kron(eye, w32[:, :, k]) for k in range(K)], axis=0)
    b_packed = jnp.tile(bias.astype(jnp.float32), batch_tile).reshape(rows_out, 1)
    row = jnp.arange(n_in, dtype=jnp.int32)[:, None]
    col = jnp.arange(_LANE + K - 1, dtype=jnp.int32)[None, :]
    u_op = (col // 2 == row).astype(jnp.float32)                        # (n_in, 128+K-1)

    kernel = functools.partial(decoder_tcn_kernel, batch_tile=batch_tile,
                               c_out=C_out, kernel_size=K)

    out_padded = pl.pallas_call(
        kernel,
        out_shape=jax.ShapeDtypeStruct((N, C_out, L_out_pad), jnp.float32),
        grid_spec=pltpu.PrefetchScalarGridSpec(
            num_scalar_prefetch=0,
            grid=(N // batch_tile,),
            in_specs=[
                pl.BlockSpec((rows_in, L_in_pad), lambda n: (n, 0)),          # streamed input
                pl.BlockSpec((K, rows_out, rows_in), lambda n: (0, 0, 0)),    # resident weights
                pl.BlockSpec((rows_out, 1), lambda n: (0, 0)),                # resident bias
                pl.BlockSpec((n_in, _LANE + K - 1), lambda n: (0, 0)),        # resident upsample op
            ],
            out_specs=pl.BlockSpec((batch_tile, C_out, L_out_pad), lambda n: (n, 0, 0)),
        ),
        compiler_params=pltpu.CompilerParams(
            dimension_semantics=("parallel",),
            vmem_limit_bytes=_vmem_limit_bytes(),
        ),
    )(x2d, w_bd, b_packed, u_op)

    # Already NCL; drop the lane padding (cheap vs. masked partial stores in the kernel).
    return out_padded[:, :, :L_out]


def reference_forward(x, weight, bias):
    """Pure-JAX reference of the intended PyTorch semantics (eval mode)."""
    x_up = jnp.repeat(x, 2, axis=2)
    N, C_in, L_up = x_up.shape
    C_out, _, K = weight.shape
    L_out = L_up - K + 1
    out = jnp.zeros((N, C_out, L_out), jnp.float32)
    for k in range(K):
        out = out + jnp.einsum("ncl,oc->nol", x_up[:, :, k:k + L_out], weight[:, :, k])
    out = out + bias[None, :, None]
    y = jnp.maximum(out, 0.0)
    mx = jnp.max(y, axis=1, keepdims=True)
    return y / (mx + 1e-5)


if __name__ == "__main__":
    # Small shapes consistent with Conv1d input (N, C_in, L).  N=16 exercises the batch
    # packing (batch_tile=4 -> M=32, contraction=16) while keeping 4 parallel grid steps.
    N, C_in, L = 16, 4, 16
    C_out, K = 8, 3

    key = jax.random.PRNGKey(0)
    kx, kw, kb = jax.random.split(key, 3)
    # Snap test inputs to bf16-representable values so the check is tight regardless of the
    # MXU's default f32 precision (bf16 passes vs. full f32) on any TPU generation.
    x = jax.random.normal(kx, (N, C_in, L), dtype=jnp.float32)
    x = x.astype(jnp.bfloat16).astype(jnp.float32)
    weight = (jax.random.normal(kw, (C_out, C_in, K), dtype=jnp.float32) * 0.2)
    weight = weight.astype(jnp.bfloat16).astype(jnp.float32)
    bias = (jax.random.normal(kb, (C_out,), dtype=jnp.float32) * 0.1)
    bias = bias.astype(jnp.bfloat16).astype(jnp.float32)

    out = jax.block_until_ready(decoder_tcn_forward(x, weight, bias))
    ref = jax.block_until_ready(reference_forward(x, weight, bias))

    assert out.shape == (N, C_out, 2 * L - K + 1), out.shape
    np.testing.assert_allclose(np.asarray(out), np.asarray(ref), rtol=1e-4, atol=1e-5)
    print("KERNEL_OK")
</pallas_src>

<mosaic_0001>
module attributes {stable_mosaic.version = 11 : i64} {
  func.func @decoder_tcn_kernel(%arg0: i32, %arg1: memref<16x65xf32, #tpu.memory_space<vmem>>, %arg2: memref<3x32x16xf32, #tpu.memory_space<vmem>>, %arg3: memref<32x1xf32, #tpu.memory_space<vmem>>, %arg4: memref<65x130xf32, #tpu.memory_space<vmem>>, %arg5: memref<4x8x128xf32, #tpu.memory_space<vmem>>) attributes {dimension_semantics = [#tpu.dimension_semantics<parallel>], iteration_bounds = array<i64: 4>, scalar_prefetch = 0 : i64, scratch_operands = 0 : i64, tpu.core_type = #tpu.core_type<tc>, window_params = [{transform_indices = @transform_0, window_bounds = array<i64: 16, 65>}, {pipeline_mode = #tpu.pipeline_mode<synchronous>, transform_indices = @transform_1, window_bounds = array<i64: 3, 32, 16>}, {pipeline_mode = #tpu.pipeline_mode<synchronous>, transform_indices = @transform_2, window_bounds = array<i64: 32, 1>}, {pipeline_mode = #tpu.pipeline_mode<synchronous>, transform_indices = @transform_3, window_bounds = array<i64: 65, 130>}, {transform_indices = @transform_4, window_bounds = array<i64: 4, 8, 128>}]} {
    %c0 = arith.constant 0 : index
    %c0_0 = arith.constant 0 : index
    %0 = vector.load %arg1[%c0, %c0_0] : memref<16x65xf32, #tpu.memory_space<vmem>>, vector<16x65xf32>
    %c0_1 = arith.constant 0 : index
    %c0_2 = arith.constant 0 : index
    %1 = vector.load %arg4[%c0_1, %c0_2] : memref<65x130xf32, #tpu.memory_space<vmem>>, vector<65x130xf32>
    %cst = arith.constant dense<0.000000e+00> : vector<16x130xf32>
    %2 = tpu.matmul %0, %1, %cst {dimension_numbers = #tpu.dot_dimension_numbers<[1], [0], [0], [1], [0, 0, 1, 1], [], []>} : vector<16x65xf32>, vector<65x130xf32>, vector<16x130xf32> -> vector<16x130xf32>
    %c0_3 = arith.constant 0 : index
    %c0_4 = arith.constant 0 : index
    %c0_5 = arith.constant 0 : index
    %3 = vector.load %arg2[%c0_3, %c0_4, %c0_5] : memref<3x32x16xf32, #tpu.memory_space<vmem>>, vector<1x32x16xf32>
    %4 = vector.shape_cast %3 : vector<1x32x16xf32> to vector<32x16xf32>
    %5 = vector.extract_strided_slice %2 {offsets = [0, 0], sizes = [16, 128], strides = [1, 1]} : vector<16x130xf32> to vector<16x128xf32>
    %cst_6 = arith.constant dense<0.000000e+00> : vector<32x128xf32>
    %6 = tpu.matmul %4, %5, %cst_6 {dimension_numbers = #tpu.dot_dimension_numbers<[1], [0], [0], [1], [0, 0, 1, 1], [], []>} : vector<32x16xf32>, vector<16x128xf32>, vector<32x128xf32> -> vector<32x128xf32>
    %c1 = arith.constant 1 : index
    %c0_7 = arith.constant 0 : index
    %c0_8 = arith.constant 0 : index
    %7 = vector.load %arg2[%c1, %c0_7, %c0_8] : memref<3x32x16xf32, #tpu.memory_space<vmem>>, vector<1x32x16xf32>
    %8 = vector.shape_cast %7 : vector<1x32x16xf32> to vector<32x16xf32>
    %9 = vector.extract_strided_slice %2 {offsets = [0, 1], sizes = [16, 128], strides = [1, 1]} : vector<16x130xf32> to vector<16x128xf32>
    %cst_9 = arith.constant dense<0.000000e+00> : vector<32x128xf32>
    %10 = tpu.matmul %8, %9, %cst_9 {dimension_numbers = #tpu.dot_dimension_numbers<[1], [0], [0], [1], [0, 0, 1, 1], [], []>} : vector<32x16xf32>, vector<16x128xf32>, vector<32x128xf32> -> vector<32x128xf32>
    %11 = arith.addf %6, %10 : vector<32x128xf32>
    %c2 = arith.constant 2 : index
    %c0_10 = arith.constant 0 : index
    %c0_11 = arith.constant 0 : index
    %12 = vector.load %arg2[%c2, %c0_10, %c0_11] : memref<3x32x16xf32, #tpu.memory_space<vmem>>, vector<1x32x16xf32>
    %13 = vector.shape_cast %12 : vector<1x32x16xf32> to vector<32x16xf32>
    %14 = vector.extract_strided_slice %2 {offsets = [0, 2], sizes = [16, 128], strides = [1, 1]} : vector<16x130xf32> to vector<16x128xf32>
    %cst_12 = arith.constant dense<0.000000e+00> : vector<32x128xf32>
    %15 = tpu.matmul %13, %14, %cst_12 {dimension_numbers = #tpu.dot_dimension_numbers<[1], [0], [0], [1], [0, 0, 1, 1], [], []>} : vector<32x16xf32>, vector<16x128xf32>, vector<32x128xf32> -> vector<32x128xf32>
    %16 = arith.addf %11, %15 : vector<32x128xf32>
    %c0_13 = arith.constant 0 : index
    %c0_14 = arith.constant 0 : index
    %17 = vector.load %arg3[%c0_13, %c0_14] : memref<32x1xf32, #tpu.memory_space<vmem>>, vector<32x1xf32>
    %18 = vector.broadcast %17 : vector<32x1xf32> to vector<32x128xf32>
    %19 = arith.addf %16, %18 : vector<32x128xf32>
    %cst_15 = arith.constant 0.000000e+00 : f32
    %20 = vector.broadcast %cst_15 : f32 to vector<32x128xf32>
    %21 = arith.maximumf %19, %20 : vector<32x128xf32>
    %22 = vector.extract_strided_slice %21 {offsets = [0, 0], sizes = [8, 128], strides = [1, 1]} : vector<32x128xf32> to vector<8x128xf32>
    %cst_16 = arith.constant dense<0xFF800000> : vector<128xf32>
    %23 = vector.multi_reduction <maximumf>, %22, %cst_16 [0] : vector<8x128xf32> to vector<128xf32>
    %24 = vector.shape_cast %23 : vector<128xf32> to vector<1x128xf32>
    %cst_17 = arith.constant 9.99999974E-6 : f32
    %25 = vector.broadcast %cst_17 : f32 to vector<1x128xf32>
    %26 = arith.addf %24, %25 : vector<1x128xf32>
    %27 = vector.broadcast %26 : vector<1x128xf32> to vector<8x128xf32>
    %28 = arith.divf %22, %27 : vector<8x128xf32>
    %c0_18 = arith.constant 0 : index
    %c0_19 = arith.constant 0 : index
    %c0_20 = arith.constant 0 : index
    %29 = vector.load %arg5[%c0_18, %c0_19, %c0_20] : memref<4x8x128xf32, #tpu.memory_space<vmem>>, vector<1x8x128xf32>
    %30 = vector.shape_cast %29 : vector<1x8x128xf32> to vector<8x128xf32>
    %31 = vector.shape_cast %28 : vector<8x128xf32> to vector<1x8x128xf32>
    tpu.vector_store %arg5[%c0_18, %c0_19, %c0_20], %31 {strides = array<i32>} : memref<4x8x128xf32, #tpu.memory_space<vmem>>, vector<1x8x128xf32>,
    %32 = vector.extract_strided_slice %21 {offsets = [8, 0], sizes = [8, 128], strides = [1, 1]} : vector<32x128xf32> to vector<8x128xf32>
    %cst_21 = arith.constant dense<0xFF800000> : vector<128xf32>
    %33 = vector.multi_reduction <maximumf>, %32, %cst_21 [0] : vector<8x128xf32> to vector<128xf32>
    %34 = vector.shape_cast %33 : vector<128xf32> to vector<1x128xf32>
    %cst_22 = arith.constant 9.99999974E-6 : f32
    %35 = vector.broadcast %cst_22 : f32 to vector<1x128xf32>
    %36 = arith.addf %34, %35 : vector<1x128xf32>
    %37 = vector.broadcast %36 : vector<1x128xf32> to vector<8x128xf32>
    %38 = arith.divf %32, %37 : vector<8x128xf32>
    %c1_23 = arith.constant 1 : index
    %c0_24 = arith.constant 0 : index
    %c0_25 = arith.constant 0 : index
    %39 = vector.load %arg5[%c1_23, %c0_24, %c0_25] : memref<4x8x128xf32, #tpu.memory_space<vmem>>, vector<1x8x128xf32>
    %40 = vector.shape_cast %39 : vector<1x8x128xf32> to vector<8x128xf32>
    %41 = vector.shape_cast %38 : vector<8x128xf32> to vector<1x8x128xf32>
    tpu.vector_store %arg5[%c1_23, %c0_24, %c0_25], %41 {strides = array<i32>} : memref<4x8x128xf32, #tpu.memory_space<vmem>>, vector<1x8x128xf32>,
    %42 = vector.extract_strided_slice %21 {offsets = [16, 0], sizes = [8, 128], strides = [1, 1]} : vector<32x128xf32> to vector<8x128xf32>
    %cst_26 = arith.constant dense<0xFF800000> : vector<128xf32>
    %43 = vector.multi_reduction <maximumf>, %42, %cst_26 [0] : vector<8x128xf32> to vector<128xf32>
    %44 = vector.shape_cast %43 : vector<128xf32> to vector<1x128xf32>
    %cst_27 = arith.constant 9.99999974E-6 : f32
    %45 = vector.broadcast %cst_27 : f32 to vector<1x128xf32>
    %46 = arith.addf %44, %45 : vector<1x128xf32>
    %47 = vector.broadcast %46 : vector<1x128xf32> to vector<8x128xf32>
    %48 = arith.divf %42, %47 : vector<8x128xf32>
    %c2_28 = arith.constant 2 : index
    %c0_29 = arith.constant 0 : index
    %c0_30 = arith.constant 0 : index
    %49 = vector.load %arg5[%c2_28, %c0_29, %c0_30] : memref<4x8x128xf32, #tpu.memory_space<vmem>>, vector<1x8x128xf32>
    %50 = vector.shape_cast %49 : vector<1x8x128xf32> to vector<8x128xf32>
    %51 = vector.shape_cast %48 : vector<8x128xf32> to vector<1x8x128xf32>
    tpu.vector_store %arg5[%c2_28, %c0_29, %c0_30], %51 {strides = array<i32>} : memref<4x8x128xf32, #tpu.memory_space<vmem>>, vector<1x8x128xf32>,
    %52 = vector.extract_strided_slice %21 {offsets = [24, 0], sizes = [8, 128], strides = [1, 1]} : vector<32x128xf32> to vector<8x128xf32>
    %cst_31 = arith.constant dense<0xFF800000> : vector<128xf32>
    %53 = vector.multi_reduction <maximumf>, %52, %cst_31 [0] : vector<8x128xf32> to vector<128xf32>
    %54 = vector.shape_cast %53 : vector<128xf32> to vector<1x128xf32>
    %cst_32 = arith.constant 9.99999974E-6 : f32
    %55 = vector.broadcast %cst_32 : f32 to vector<1x128xf32>
    %56 = arith.addf %54, %55 : vector<1x128xf32>
    %57 = vector.broadcast %56 : vector<1x128xf32> to vector<8x128xf32>
    %58 = arith.divf %52, %57 : vector<8x128xf32>
    %c3 = arith.constant 3 : index
    %c0_33 = arith.constant 0 : index
    %c0_34 = arith.constant 0 : index
    %59 = vector.load %arg5[%c3, %c0_33, %c0_34] : memref<4x8x128xf32, #tpu.memory_space<vmem>>, vector<1x8x128xf32>
    %60 = vector.shape_cast %59 : vector<1x8x128xf32> to vector<8x128xf32>
    %61 = vector.shape_cast %58 : vector<8x128xf32> to vector<1x8x128xf32>
    tpu.vector_store %arg5[%c3, %c0_33, %c0_34], %61 {strides = array<i32>} : memref<4x8x128xf32, #tpu.memory_space<vmem>>, vector<1x8x128xf32>,
    return
  }
  func.func @transform_0(%arg0: i32) -> (i32, i32) {
    %c0_i32 = arith.constant 0 : i32
    %c0_i32_0 = arith.constant 0 : i32
    return %arg0, %c0_i32 : i32, i32
  }
  func.func @transform_1(%arg0: i32) -> (i32, i32, i32) {
    %c0_i32 = arith.constant 0 : i32
    %c0_i32_0 = arith.constant 0 : i32
    %c0_i32_1 = arith.constant 0 : i32
    %c0_i32_2 = arith.constant 0 : i32
    return %c0_i32, %c0_i32_0, %c0_i32_1 : i32, i32, i32
  }
  func.func @transform_2(%arg0: i32) -> (i32, i32) {
    %c0_i32 = arith.constant 0 : i32
    %c0_i32_0 = arith.constant 0 : i32
    %c0_i32_1 = arith.constant 0 : i32
    return %c0_i32, %c0_i32_0 : i32, i32
  }
  func.func @transform_3(%arg0: i32) -> (i32, i32) {
    %c0_i32 = arith.constant 0 : i32
    %c0_i32_0 = arith.constant 0 : i32
    %c0_i32_1 = arith.constant 0 : i32
    return %c0_i32, %c0_i32_0 : i32, i32
  }
  func.func @transform_4(%arg0: i32) -> (i32, i32, i32) {
    %c0_i32 = arith.constant 0 : i32
    %c0_i32_0 = arith.constant 0 : i32
    %c0_i32_1 = arith.constant 0 : i32
    return %arg0, %c0_i32, %c0_i32_0 : i32, i32, i32
  }
}

</mosaic_0001>

<bundles_post_ra>
// kernel: tpu_custom_call.1
= control target key start
LH: loop header
LB: loop body
LE: loop exit
PB: predicated region body
PF: predicated region fallthrough
CT: control target
= control target key end

     0   :  { %9 = vsyncpa [#allocation3], 0  ;;  %s1312_s0 = inlined_call_operand.vmem [shape: f32[64,65], index: 0, kind: input, shape index: {}]   ;;  %s1313_s1 = inlined_call_operand.vmem [shape: f32[3,32,16], index: 1, kind: input, shape index: {}]   ;;  %s1314_s2 = inlined_call_operand.vmem [shape: f32[32,1], index: 2, kind: input, shape index: {}]   ;;  %s1315_s3 = inlined_call_operand.vmem [shape: f32[65,130], index: 3, kind: input, shape index: {}]   ;;  %s1316_s4 = inlined_call_operand.hbm [shape: f32[16,8,128], index: 4, kind: output, shape index: {}]  }
   0x1   :  { %11 = vsyncpa [#allocation3 + $0x1], 0  ;;  %s1096_s15 = smov 0   ;;  %s1098_s16 = smov 0  }
   0x2   :  { %s1100_s17 = smov 0   ;;  %s1102_s18 = smov 0  }
   0x3 LB: > { %s1117_s19 = sadd.s32 4294967295, %s1062_s18   ;;  %s801_s20 = sadd.s32 4294967294, %s1062_s18   ;;  %s1062_s18 = sphi %s1102_s18, %s1322_s18   ;;  %s1058_s17 = sphi %s1100_s17, %s1321_s17   ;;  %s1054_s16 = sphi %s1098_s16, %s1320_s16   ;;  %s1050_s15 = sphi %s1096_s15, %s1319_s15  }
   0x4   : > { %s1121_s21 = sadd.s32 1, %s1062_s18   ;;  %s113_s22 = sadd.s32 1, %s1058_s17 }
   0x5   : > { %s110_s23 = ssub.s32 %s1062_s18, %s1121_s21  ;;  %p123_p0 = scmp.ne.s32.totalorder %s1058_s17, %s1054_s16 }
   0x6   : > { %p111_p1 = scmp.eq.s32.totalorder %s110_s23, 0  ;;  %p124_p2 = scmp.eq.s32.totalorder %s1117_s19, 3 }
   0x7   : > { %p129_p3 = scmp.ne.s32.totalorder %s1054_s16, %s1050_s15  ;;  %p130_p4 = scmp.eq.s32.totalorder %s801_s20, 3 }
   0x8   : > { %s1132_s24 = scalar_select %p111_p1, %s1058_s17, %s113_s22  }
   0x9   : > { %p1134_p5 = por %p124_p2, %p123_p0  ;;  %p1138_p6 = por %p130_p4, %p129_p3 }
   0xa   : > { %p804_p7 = scmp.ge.s32.totalorder %s1062_s18, 1  ;;  %p166_p8 = scmp.lt.s32.totalorder %s1062_s18, 5 }
   0xc   : > { %p167_p9 = pnand %p804_p7, %p166_p8 }
   0xd   : > { %v202_v0 = vld [vmem:[%s1315_s3 + $0x8] sm:$0xff] (!%p167_p9)  ;;  %v204_v1 = vld [vmem:[%s1315_s3 + $0x18] sm:$0xff] (!%p167_p9)  ;;  %v201_v2 = vld [vmem:[%s1315_s3] sm:$0xff] (!%p167_p9)  ;;  %v1064_v7 = vmov (!%p167_p9), 0.0   ;;  %s806_s13 = sshll.u32 (!%p167_p9), %s1117_s19, 1  ;;  %vm226_vm0 = vcmask (!%p167_p9), 1040384  }
   0xe   : > { %170 = sbr.rel (%p167_p9) target bundleno = 656 (0x290), region = 36  ;;  %v889_v3 = vpack.c.bf16 (!%p167_p9), %v204_v1, %v202_v0  ;;  %v203_v4 = vld [vmem:[%s1315_s3 + $0x10] sm:$0xff] (!%p167_p9)  ;;  %v206_v5 = vld [vmem:[%s1315_s3 + $0x28] sm:$0xff] (!%p167_p9)  ;;  %v208_v6 = vld [vmem:[%s1315_s3 + $0x38] sm:$0xff] (!%p167_p9)  ;;  %297 = vmatprep.mubr.f32.mxu0 (!%p167_p9), %v1064_v7  ;;  %p193_p10 = scmp.lt.s32.totalorder (!%p167_p9), %s806_s13, 7  ;;  %vm219_vm1 = vcmask (!%p167_p9), 531456  }
   0xf   : > { %v891_v8 = vpack.c.bf16 (!%p167_p9), %v203_v4, %v201_v2  ;;  %v893_v9 = vpack.c.bf16 (!%p167_p9), %v208_v6, %v206_v5  ;;  %v205_v10 = vld [vmem:[%s1315_s3 + $0x20] sm:$0xff] (!%p167_p9)  ;;  %v207_v11 = vld [vmem:[%s1315_s3 + $0x30] sm:$0xff] (!%p167_p9)  ;;  %v210_v12 = vld [vmem:[%s1315_s3 + $0x48] sm:$0xff] (!%p167_p9)  ;;  %vm336_vm2 = vcmask (!%p167_p9), 130048   ;;  %s1065_s10 = smov (!%p167_p9), 126   ;;  %s1066_s11 = smov (!%p167_p9), 127  }
  0x10   : > { %890 = vmatprep.subr.bf16.mxu0 (!%p167_p9), %v889_v3  ;;  %v212_v13 = vld [vmem:[%s1315_s3 + $0x58] sm:$0xff] (!%p167_p9)  ;;  %v895_v14 = vpack.c.bf16 (!%p167_p9), %v207_v11, %v205_v10  ;;  %v209_v16 = vld [vmem:[%s1315_s3 + $0x40] sm:$0xff] (!%p167_p9)  ;;  %v211_v17 = vld [vmem:[%s1315_s3 + $0x50] sm:$0xff] (!%p167_p9)  ;;  %v1067_v39 = vmov (!%p167_p9), 0   ;;  %vm331_vm3 = vcmask (!%p167_p9), 1039360   ;;  %vm544_vm4 = vcmask (!%p167_p9), 1031168  }
  0x11   : > { %892 = vmatpush1.bf16.msra.mxu0 (!%p167_p9), %v891_v8  ;;  %v897_v15 = vpack.c.bf16 (!%p167_p9), %v212_v13, %v210_v12  ;;  %v214_v18 = vld [vmem:[%s1315_s3 + $0x68] sm:$0xff] (!%p167_p9)  ;;  %v216_v19 = vld [vmem:[%s1315_s3 + $0x78] sm:$0xff] (!%p167_p9)  ;;  %v899_v20 = vpack.c.bf16 (!%p167_p9), %v211_v17, %v209_v16  ;;  %v213_v22 = vld [vmem:[%s1315_s3 + $0x60] sm:$0xff] (!%p167_p9)  ;;  %991 = vset.pattern.permute.xlu1 (!%p167_p9), %v1067_v39 }
  0x12   : > { %894 = vmatprep.subr.bf16.mxu0 (!%p167_p9), %v893_v9  ;;  %v901_v21 = vpack.c.bf16 (!%p167_p9), %v216_v19, %v214_v18  ;;  %v215_v23 = vld [vmem:[%s1315_s3 + $0x70] sm:$0xff] (!%p167_p9)  ;;  %v218_v25 = vld [vmem:[%s1315_s3 + $0x88] sm:$0x1] (!%p167_p9)  ;;  %v217_v26 = vld [vmem:[%s1315_s3 + $0x80] sm:$0x1] (!%p167_p9)  ;;  %990 = vset.pattern.permute.xlu0 (!%p167_p9), %v1067_v39 }
  0x13   : > { %v903_v24 = vpack.c.bf16 (!%p167_p9), %v215_v23, %v213_v22  ;;  %v812_v32 = vld [vmem:[%s1313_s1 + $0x20] sm:$0xff] (!%p167_p9)  ;;  %v651_v37 = vld [vmem:[%s1314_s2 + $0x8] sm:$0xff] (!%p167_p9)  ;;  %v652_v40 = vld [vmem:[%s1314_s2 + $0x10] sm:$0xff] (!%p167_p9) }
  0x14   : > { %863 = vmatprep.mubr.msk.f32.mxu1 (!%p167_p9), %vm336_vm2, %v812_v32  ;;  %v650_v38 = vld [vmem:[%s1314_s2] sm:$0xff] (!%p167_p9)  ;;  %v653_v41 = vld [vmem:[%s1314_s2 + $0x18] sm:$0xff] (!%p167_p9)  ;;  %v813_v57 = vld [vmem:[%s1313_s1 + $0x28] sm:$0xff] (!%p167_p9) }
  0x15   : > { %896 = vmatpush1.bf16.msra.mxu0 %v895_v14  ;;  %s1324_s13 = smov (!%p193_p10, %s806_s13), 7  ;;  %v814_v59 = vld [vmem:[%s1313_s1 + $0x30] sm:$0xff]  ;;  %v815_v62 = vld [vmem:[%s1313_s1 + $0x38] sm:$0xff]  ;;  %v310_v63 = vld [vmem:[%s1313_s1] sm:$0xff] }
  0x16   : > { %898 = vmatprep.subr.bf16.mxu0 %v897_v15  ;;  %s807_s27 = sshll.u32 %s1324_s13, 3  ;;  %v311_v0 = vld [vmem:[%s1313_s1 + $0x8] sm:$0xff]  ;;  %v312_v1 = vld [vmem:[%s1313_s1 + $0x10] sm:$0xff]  ;;  %v313_v2 = vld [vmem:[%s1313_s1 + $0x18] sm:$0xff]  ;;  %s189_s13 = sand.u32 1, %s1054_s16  }
  0x17   : > { %s196_s6 = scalar_lea.vmem %s1312_s0, %s807_s27  ;;  %v824_v3 = vld [vmem:[%s1313_s1 + $0x40] sm:$0xff]  ;;  %v825_v4 = vld [vmem:[%s1313_s1 + $0x48] sm:$0xff]  ;;  %v826_v5 = vld [vmem:[%s1313_s1 + $0x50] sm:$0xff]  ;;  %s805_s9 = sshll.u32 %s189_s13, 5 }
  0x18   : > { %v199_v27 = vld [vmem:[%s196_s6] sm:$0xff]  ;;  %v200_v28 = vld [vmem:[%s196_s6 + $0x8] sm:$0xff]  ;;  %v827_v6 = vld [vmem:[%s1313_s1 + $0x58] sm:$0xff]  ;;  %s1068_s27 = smov [#allocation2]  }
  0x19   : > { %900 = vmatpush1.bf16.msra.mxu0 %v899_v20  ;;  %s1004_s28 = sshll.u32 %s1068_s27, 4  ;;  %s1005_s28 = int_to_ptr.vmem [resolvable:$false] %s1004_s28 }
  0x1a   : > { %902 = vmatprep.subr.bf16.mxu0 %v901_v21  ;;  %s1006_s29 = scalar_lea.vmem %s1005_s28, 1024 }
  0x1d   : > { %904 = vmatpush1.bf16.msra.mxu0 %v903_v24 }
  0x1e   : > { %808 = vmatprep.subr.msk.mxu0 %vm226_vm0, %v218_v25 }
  0x21   : > { %809 = vmatpush1.msk.msra.mxu0 %vm226_vm0, %v217_v26 }
  0x22   : > { %810 = vmatmul.mubr.msk.f32.vlgmr.msra.gmra.mrb[0].mxu0 %vm219_vm1, %v199_v27 }
  0x23   : > { %303 = vmatprep.mubr.f32.mxu0 %v1064_v7 }
  0x26   : > { %811 = vmatmul.mubr.msk.f32.gmra.mrb[2].mxu0 %vm219_vm1, %v200_v28 }
  0xf5   : > { %v299_v29 = vpop.f32.mrb[0].mxu0 }
  0xf6   : > { %v301_v30 = vpop.f32.mrb[1].mxu0 }
  0xf7   : > { %v980_v31 = vpack.i.bf16 %v301_v30, %v299_v29 }
  0xf9   : > { %981 = vrot.lane.b32.xlu1 %v980_v31, %s1065_s10  ;;  %971 = vrot.lane.b32.xlu0 %v980_v31, %s1066_s11  ;;  %v305_v33 = vpop.f32.mrb[2].mxu0 }
  0xfa   : > { %v909_v34 = vpack.c.bf16 %v305_v33, %v299_v29  ;;  %v307_v35 = vpop.f32.mrb[3].mxu0 }
  0xfb   : > { %v985_v36 = vpack.i.bf16 %v307_v35, %v305_v33 }
  0xfd   : > { %986 = vrot.lane.b32.xlu1 %v985_v36, %s1065_s10  ;;  %976 = vrot.lane.b32.xlu0 %v985_v36, %s1066_s11  ;;  %s840_s10 = sshll.u32 %s1117_s19, 9  ;;  %s191_s11 = scalar_lea.vmem [#allocation2], %s805_s9 }
  0xfe   : > { %s739_s12 = sshll.u32 %s191_s11, 4  ;;  %s1267_s22 = scalar_lea.hbm %s1316_s4, %s840_s10  ;;  %s1269_s12 = int_to_ptr.vmem [resolvable:$true] %s739_s12 }
  0xff   : > { %s1271_s19 = scalar_lea.sflag [#allocation3], %s189_s13  ;;  %s1000_s23 = scalar_lea.vmem %s1269_s12, 512 }
 0x100   : > { %p1001_p11 = scmp.ne.s32.totalorder %s1269_s12, %s1000_s23  ;;  %p1007_p0 = scmp.lt.s32.totalorder %s1269_s12, %s1005_s28 }
 0x101   : > { %661 = vperm.xlu1 %991, %v651_v37   ;;  %656 = vperm.xlu0 %990, %v650_v38   ;;  %p1008_p1 = scmp.lt.s32.totalorder %s1006_s29, %s1000_s23 }
 0x102   : > { %p1002_p12 = pnand %p1001_p11, %p1134_p5 }
 0x103   : > { %p1009_p2 = por %p1008_p1, %p1007_p0 }
 0x104   : > { %p1003_p13 = pneg %p1002_p12 }
 0x105   : > { %666 = vperm.xlu1 %991, %v652_v40   ;;  %671 = vperm.xlu0 %990, %v653_v41  }
 0x106   : > { %p1010_p3 = pnand %p1009_p2, %p1003_p13 }
 0x16b   : > { %v982_v42 = vpop.permute.xlu1 %981  ;;  %v972_v43 = vpop.permute.xlu0 %971 }
 0x16c   : > { %v974_v44 = vunpack.i.h.bf16 %v972_v43  ;;  %v973_v45 = vunpack.i.l.bf16 %v972_v43  ;;  %v984_v55 = vunpack.i.h.bf16 %v982_v42  ;;  %v983_v56 = vunpack.i.l.bf16 %v982_v42 }
 0x16e   : > { %v332_v52 = vsel %vm331_vm3, %v973_v45, %v974_v44  ;;  %v545_v60 = vsel %vm544_vm4, %v983_v56, %v984_v55 }
 0x16f   : > { %v987_v46 = vpop.permute.xlu1 %986  ;;  %v977_v47 = vpop.permute.xlu0 %976 }
 0x170   : > { %v979_v48 = vunpack.i.h.bf16 %v977_v47  ;;  %v978_v49 = vunpack.i.l.bf16 %v977_v47  ;;  %v989_v50 = vunpack.i.h.bf16 %v987_v46  ;;  %v988_v51 = vunpack.i.l.bf16 %v987_v46 }
 0x172   : > { %v333_v53 = vsel %vm331_vm3, %v978_v49, %v979_v48  ;;  %v546_v58 = vsel %vm544_vm4, %v988_v51, %v989_v50 }
 0x173   : > { %v905_v54 = vpack.c.bf16 %v333_v53, %v332_v52  ;;  %v913_v61 = vpack.c.bf16 %v546_v58, %v545_v60 }
 0x175   : > { %906 = vmatprep.subr.bf16.mxu1 %v905_v54 }
 0x176   : > { %908 = vmatpush3.bf16.msra.mxu1 %v905_v54 }
 0x177   : > { %910 = vmatprep.subr.bf16.mxu1 %v909_v34 }
 0x179   : > { %864 = vmatmul.mubr.msk.f32.vlgmr.msra.gmra.mrb[0].mxu1 %vm336_vm2, %v813_v57 }
 0x17a   : > { %912 = vmatpush3.bf16.msra.mxu1 %v909_v34  ;;  %866 = vmatprep.mubr.msk.f32.mxu1 %vm336_vm2, %v814_v59 }
 0x17b   : > { %914 = vmatprep.subr.bf16.mxu1 %v913_v61 }
 0x17d   : > { %867 = vmatmul.mubr.msk.f32.gmra.mrb[2].mxu1 %vm336_vm2, %v815_v62 }
 0x17e   : > { %873 = vmatprep.mubr.msk.f32.mxu1 %vm336_vm2, %v310_v63 }
 0x180   : > { %v657_v7 = vpop.permute.xlu0 %656  ;;  %v662_v8 = vpop.permute.xlu1 %661 }
 0x181   : > { %874 = vmatmul.mubr.msk.f32.vlgmr.msra.gmra.mrb[0].mxu1 %vm336_vm2, %v311_v0 }
 0x182   : > { %916 = vmatpush3.bf16.msra.mxu1 %v913_v61  ;;  %876 = vmatprep.mubr.msk.f32.mxu1 %vm336_vm2, %v312_v1 }
 0x184   : > { %v672_v15 = vpop.permute.xlu0 %671  ;;  %v667_v18 = vpop.permute.xlu1 %666 }
 0x185   : > { %877 = vmatmul.mubr.msk.f32.gmra.mrb[2].mxu1 %vm336_vm2, %v313_v2 }
 0x186   : > { %883 = vmatprep.mubr.msk.f32.mxu1 %vm336_vm2, %v824_v3 }
 0x189   : > { %884 = vmatmul.mubr.msk.f32.vlgmr.msra.gmra.mrb[0].mxu1 %vm336_vm2, %v825_v4 }
 0x18a   : > { %886 = vmatprep.mubr.msk.f32.mxu1 %vm336_vm2, %v826_v5 }
 0x18d   : > { %887 = vmatmul.mubr.msk.f32.gmra.mrb[2].mxu1 %vm336_vm2, %v827_v6 }
 0x25c   : > { %v885_v9 = vpop.f32.mrb[0].mxu1 }
 0x25d   : > { %v675_v10 = vadd.f32 %v885_v9, %v662_v8  ;;  %v627_v11 = vpop.f32.mrb[1].mxu1 }
 0x25e   : > { %v674_v12 = vadd.f32 %v657_v7, %v627_v11 }
 0x25f   : > { %v679_v13 = vmax.f32 %v675_v10, 0.0 }
 0x260   : > { %v678_v14 = vmax.f32 %v674_v12, 0.0  ;;  %v888_v16 = vpop.f32.mrb[2].mxu1 }
 0x261   : > { %v692_v17 = vrot.slane %v679_v13, 4  ;;  %v677_v19 = vadd.f32 %v888_v16, %v672_v15  ;;  %v637_v20 = vpop.f32.mrb[3].mxu1 }
 0x262   : > { %v682_v21 = vrot.slane %v678_v14, 4  ;;  %v676_v22 = vadd.f32 %v667_v18, %v637_v20 }
 0x263   : > { %v693_v23 = vmax.f32 %v679_v13, %v692_v17  ;;  %v681_v24 = vmax.f32 %v677_v19, 0.0 }
 0x264   : > { %v683_v25 = vmax.f32 %v678_v14, %v682_v21  ;;  %v680_v26 = vmax.f32 %v676_v22, 0.0 }
 0x265   : > { %v694_v27 = vrot.slane %v693_v23, 2  ;;  %v714_v28 = vrot.slane %v681_v24, 4 }
 0x266   : > { %v684_v29 = vrot.slane %v683_v25, 2  ;;  %v703_v30 = vrot.slane %v680_v26, 4 }
 0x267   : > { %v695_v31 = vmax.f32 %v693_v23, %v694_v27  ;;  %v715_v32 = vmax.f32 %v681_v24, %v714_v28 }
 0x268   : > { %v685_v33 = vmax.f32 %v683_v25, %v684_v29  ;;  %v704_v34 = vmax.f32 %v680_v26, %v703_v30 }
 0x269   : > { %v696_v35 = vrot.slane %v695_v31, 1  ;;  %v716_v36 = vrot.slane %v715_v32, 2 }
 0x26a   : > { %v686_v37 = vrot.slane %v685_v33, 1  ;;  %v705_v38 = vrot.slane %v704_v34, 2 }
 0x26b   : > { %v697_v39 = vmax.f32 %v695_v31, %v696_v35  ;;  %v717_v40 = vmax.f32 %v715_v32, %v716_v36 }
 0x26c   : > { %v687_v41 = vmax.f32 %v685_v33, %v686_v37  ;;  %v706_v42 = vmax.f32 %v704_v34, %v705_v38 }
 0x26d   : > { %v698_v43 = vadd.f32 1e-05, %v697_v39  ;;  %v718_v44 = vrot.slane %v717_v40, 1 }
 0x26e   : > { %v688_v45 = vadd.f32 1e-05, %v687_v41  ;;  %v707_v46 = vrot.slane %v706_v42, 1 }
 0x26f   : > { %992 = vrcp.f32 %v698_v43  ;;  %v719_v47 = vmax.f32 %v717_v40, %v718_v44 }
 0x270   : > { %994 = vrcp.f32 %v688_v45  ;;  %v708_v48 = vmax.f32 %v706_v42, %v707_v46 }
 0x271   : > { %v720_v49 = vadd.f32 1e-05, %v719_v47 }
 0x272   : > { %v709_v50 = vadd.f32 1e-05, %v708_v48 }
 0x273   : > { %996 = vrcp.f32 %v720_v49 }
 0x274   : > { %998 = vrcp.f32 %v709_v50 }
 0x279   : > { %v993_v51 = vpop.eup %992 }
 0x27a   : > { %v995_v52 = vpop.eup %994  ;;  %v700_v53 = vmul.f32 %v993_v51, %v679_v13 }
 0x27b   : > { %v690_v54 = vmul.f32 %v995_v52, %v678_v14 }
 0x27c   : > { %832 = vst [vmem:[%s191_s11 + $0x8] sm:$0xff] %v700_v53 }
 0x27d   : > { %v997_v55 = vpop.eup %996  ;;  %691 = vst [vmem:[%s191_s11] sm:$0xff] %v690_v54 }
 0x27e   : > { %v999_v56 = vpop.eup %998  ;;  %v722_v57 = vmul.f32 %v997_v55, %v681_v24 }
 0x27f   : > { %v711_v58 = vmul.f32 %v999_v56, %v680_v26 }
 0x280   : > { %834 = vst [vmem:[%s191_s11 + $0x18] sm:$0xff] %v722_v57 }
 0x281   : > { %833 = vst [vmem:[%s191_s11 + $0x10] sm:$0xff] %v711_v58 }
 0x282   : > { %1013 = shalt.err (!%p1010_p3)
}
 0x283   : > { %s1014_s30 = scalar_lea.hbm %s1267_s22, 512  ;;  %s1018_s7 = scalar_lea.hbm %s1316_s4, 2048 }
 0x284   : > { %p1015_p4 = scmp.ne.s32.totalorder %s1267_s22, %s1014_s30  ;;  %p1019_p9 = scmp.lt.u32.totalorder %s1267_s22, %s1316_s4 }
 0x285   : > { %p1020_p10 = scmp.lt.u32.totalorder %s1018_s7, %s1014_s30  ;;  %p1022_p12 = scmp.lt.u32.totalorder %s1014_s30, %s1267_s22 }
 0x286   : > { %p1016_p7 = pnand %p1015_p4, %p1134_p5 }
 0x287   : > { %p1021_p11 = por %p1020_p10, %p1019_p9 }
 0x288   : > { %p1017_p8 = pneg %p1016_p7 }
 0x289   : > { %p1023_p13 = por %p1022_p12, %p1021_p11 }
 0x28b   : > { %p1024_p0 = pnand %p1023_p13, %p1017_p8 }
 0x28d   : > { %1027 = shalt.err (!%p1024_p0)
}
 0x28e   : > { %s1069_s9 = smov 128   ;;  %s1070_s10 = smov 8  }
 0x28f   : > { %925 = dma.vmem_to_hbm [thread:$0]  (%p1134_p5), %s1269_s12, 512, %s1267_s22, %s1271_s19, %s1069_s9, %s1069_s9, %s1070_s10  }
 0x290 PF: > { %p931_p1 = scmp.ge.s32.totalorder %s1062_s18, 2  ;;  %s754_s11 = sand.u32 1, %s1050_s15  }
 0x291   : > { %s755_s14 = scalar_lea.sflag [#allocation3], %s754_s11 }
 0x292   : > { %p928_p2 = pnand %p931_p1, %p1138_p6 }
 0x294   : > { %1045 = dma.done.wait (!%p928_p2), %s755_s14, 512  }
 0x295   : > { %1047 = vsyncadd (!%p928_p2), %s755_s14, 4294966784  ;;  %p14_p3 = scmp.ge.s32.totalorder %s1121_s21, 6   ;;  %s1319_s15 = smov %s1054_s16 }
 0x296   : > { %s1320_s16 = smov %s1058_s17  ;;  %s1321_s17 = smov %s1132_s24 }
 0x297   : > { %s1322_s18 = smov %s1121_s21  ;;  %16 = sbr.rel (!%p14_p3) target bundleno = 3 (0x3), region = 76 }
 0x29e   :  { %760 = vsyncpa [#allocation3], 1 }
 0x29f   :  { %762 = vsyncpa [#allocation3 + $0x1], 1 }

</bundles_post_ra>
